<compile_context>
chip_gen: v5e
topology: v5e:2x2
jax: 0.10.0
libtpu: 0.0.40
codegen_flags: <defaults>
</compile_context>

<pallas_src>
import jax
import jax.numpy as jnp
from jax import lax
from jax.experimental import pallas as pl
from jax.experimental.pallas import tpu as pltpu

EPS = 1e-5


def _round_up(v, m):
    return (v + m - 1) // m * m


def _sublane_multiple(dtype):
    return {4: 8, 2: 16, 1: 32}.get(jnp.dtype(dtype).itemsize, 8)


def _pick_tile(full, target):
    """Largest multiple of 128 that divides `full` (a multiple of 128) and is <= target."""
    best = 128
    cand = 128
    limit = min(target, full)
    while cand <= limit:
        if full % cand == 0:
            best = cand
        cand += 128
    return best


def _make_kernel(n_real, n_pad):
    def kernel(x_ref, gamma_ref, beta_ref, wt_ref, feat_ref, cls_ref):
        # x_ref:      (n_pad, d_pad)  resident full batch (constant block index)
        # gamma/beta: (1, d_pad)
        # wt_ref:     (d_pad, tC)     pre-transposed weight tile (D, C layout)
        # feat_ref:   (n_pad, d_pad)  resident BN output (written once, read every step)
        # cls_ref:    (n_pad, tC)     classifier output tile for this grid step

        @pl.when(pl.program_id(0) == 0)
        def _():
            xf = x_ref[...].astype(jnp.float32)
            inv_n = jnp.float32(1.0 / n_real)
            # Two-pass statistics over the REAL batch rows only (padded rows are
            # zero so they don't affect the sum; they are masked out of the var).
            mean = jnp.sum(xf, axis=0, keepdims=True) * inv_n            # (1, D)
            centered = xf - mean
            if n_pad != n_real:
                rows = lax.broadcasted_iota(jnp.int32, centered.shape, 0)
                sq = jnp.where(rows < n_real, centered * centered, 0.0)
            else:
                sq = centered * centered
            var = jnp.sum(sq, axis=0, keepdims=True) * inv_n             # biased
            inv_std = lax.rsqrt(var + EPS)
            feat = centered * (inv_std * gamma_ref[...]) + beta_ref[...]
            feat_ref[...] = feat.astype(feat_ref.dtype)

        # One deep-K matmul per C tile: operands in storage dtype (no upcast),
        # f32 accumulation inside the MXU.
        cls_ref[...] = jnp.dot(
            feat_ref[...], wt_ref[...], preferred_element_type=jnp.float32
        ).astype(cls_ref.dtype)

    return kernel


def bn_classifier(x, gamma, beta, weight):
    """x: (N, D); gamma/beta: (D,); weight: (C, D) [PyTorch Linear layout]."""
    n, d = x.shape
    c = weight.shape[0]
    out_dtype = x.dtype

    sub = _sublane_multiple(out_dtype)
    n_pad = _round_up(n, sub)
    d_pad = _round_up(d, 128)
    c_pad = _round_up(c, 128)

    # Zero-pad: padded feature columns normalize to exactly 0 (gamma=1/beta=0
    # pads) and padded weight rows/cols contribute nothing; padded batch rows
    # are masked out of the BN statistics and sliced off below.
    if n_pad != n or d_pad != d:
        x = jnp.pad(x, ((0, n_pad - n), (0, d_pad - d)))
    if d_pad != d:
        gamma = jnp.pad(gamma, (0, d_pad - d), constant_values=1.0)
        beta = jnp.pad(beta, (0, d_pad - d))
        weight = jnp.pad(weight, ((0, 0), (0, d_pad - d)))
    if c_pad != c:
        weight = jnp.pad(weight, ((0, c_pad - c), (0, 0)))

    gamma2 = gamma.reshape(1, d_pad).astype(jnp.float32)
    beta2 = beta.reshape(1, d_pad).astype(jnp.float32)
    # One amortized XLA-side transpose to (D, C) + dtype match with the
    # activations: the in-kernel contraction is a plain row-major matmul.
    wt = weight.T.astype(out_dtype)

    x_bytes = jnp.dtype(x.dtype).itemsize
    w_bytes = jnp.dtype(wt.dtype).itemsize
    o_bytes = jnp.dtype(out_dtype).itemsize

    # Generation-aware VMEM budget (~96 MiB usable on v5e/v6e, ~48 MiB on v7x).
    try:
        vmem_cap = int(pltpu.get_tpu_info().vmem_capacity_bytes)
    except Exception:  # conservative fallback: works on every generation
        vmem_cap = 64 << 20
    usable = int(0.75 * vmem_cap)
    headroom = 2 << 20

    # Resident (grid-constant) footprint; budget 2 buffers conservatively.
    fixed_bytes = (
        2 * n_pad * d_pad * x_bytes        # x (resident input)
        + 2 * n_pad * d_pad * o_bytes      # feat (resident output)
        + 2 * 2 * 8 * d_pad * 4            # gamma + beta (1-row blocks pad to 8 sublanes)
    )
    min_stream = 2 * (d_pad * w_bytes + n_pad * o_bytes) * 128
    if fixed_bytes + headroom + min_stream > usable:
        raise ValueError(
            "BNClassifier kernel keeps the full (N, D) batch resident in VMEM; "
            f"N={n_pad}, D={d_pad} does not fit the {usable >> 20} MiB budget. "
            "Tile the feature dim (TODO) or reduce the batch."
        )

    want_triple = n_pad <= 256                      # small batch => weight-streaming bound
    w_bufs = 3 if want_triple else 2
    per_tc = w_bufs * d_pad * w_bytes + 2 * n_pad * o_bytes   # bytes per unit of tc
    tc_budget = usable - headroom - fixed_bytes
    tc_target = max(128, min(2048, (tc_budget // per_tc) // 128 * 128))
    tc = _pick_tile(c_pad, int(tc_target))
    num_c_tiles = c_pad // tc

    tile_bytes = fixed_bytes + per_tc * tc
    vmem_limit = int(min(max(tile_bytes * 1.25 + headroom, 16 << 20), usable))

    # Deeper buffering on the streamed weight only when it can actually help.
    w_spec = None
    if want_triple and num_c_tiles >= 3:
        try:
            w_spec = pl.BlockSpec(
                (d_pad, tc), lambda j: (0, j), pipeline_mode=pl.Buffered(3)
            )
        except Exception:
            w_spec = None
    if w_spec is None:
        w_spec = pl.BlockSpec((d_pad, tc), lambda j: (0, j))

    kernel = _make_kernel(n, n_pad)

    feat, cls = pl.pallas_call(
        kernel,
        out_shape=(
            jax.ShapeDtypeStruct((n_pad, d_pad), out_dtype),
            jax.ShapeDtypeStruct((n_pad, c_pad), out_dtype),
        ),
        grid_spec=pltpu.PrefetchScalarGridSpec(
            num_scalar_prefetch=0,
            grid=(num_c_tiles,),
            in_specs=[
                pl.BlockSpec((n_pad, d_pad), lambda j: (0, 0)),   # x (resident)
                pl.BlockSpec((1, d_pad), lambda j: (0, 0)),       # gamma
                pl.BlockSpec((1, d_pad), lambda j: (0, 0)),       # beta
                w_spec,                                           # weight (D, C)
            ],
            out_specs=(
                pl.BlockSpec((n_pad, d_pad), lambda j: (0, 0)),   # feature (resident)
                pl.BlockSpec((n_pad, tc), lambda j: (0, j)),      # cls_score tile
            ),
        ),
        compiler_params=pltpu.CompilerParams(
            # Single sequential axis: BN runs once on step 0 and the resident
            # feat block is reused by every C tile.
            dimension_semantics=("arbitrary",),
            vmem_limit_bytes=vmem_limit,
        ),
        cost_estimate=pl.CostEstimate(
            flops=2 * n_pad * d_pad * c_pad + 8 * n_pad * d_pad,
            transcendentals=d_pad,
            bytes_accessed=(
                x_bytes * n_pad * d_pad          # x read once
                + w_bytes * d_pad * c_pad        # weight read once
                + o_bytes * n_pad * d_pad        # feat written once
                + o_bytes * n_pad * c_pad        # cls written once
                + 2 * 4 * d_pad                  # gamma + beta
            ),
        ),
    )(x, gamma2, beta2, wt)

    return feat[:n, :d], cls[:n, :c]


def reference(x, gamma, beta, weight):
    x32 = x.astype(jnp.float32)
    mean = jnp.mean(x32, axis=0, keepdims=True)
    var = jnp.mean((x32 - mean) ** 2, axis=0, keepdims=True)  # biased, train-mode
    feat = (x32 - mean) / jnp.sqrt(var + EPS) * gamma[None, :] + beta[None, :]
    cls = feat @ weight.T.astype(jnp.float32)
    return feat, cls


if __name__ == "__main__":
    # Small shapes consistent with BNClassifier(in_dim, class_num).
    # class_num=64 exercises the pad-to-128 lane-dense path.
    N, IN_DIM, CLASS_NUM = 8, 128, 64

    key = jax.random.PRNGKey(0)
    kx, kw = jax.random.split(key)

    x = jax.random.normal(kx, (N, IN_DIM), dtype=jnp.float32)

    # Deterministic parameter init mirroring the module's __init__:
    #   BatchNorm1d: weight=1, bias=0 (kaiming branch for BatchNorm)
    gamma = jnp.ones((IN_DIM,), dtype=jnp.float32)
    beta = jnp.zeros((IN_DIM,), dtype=jnp.float32)
    #   Linear(in_dim, class_num, bias=False): weight ~ N(0, 0.001)
    weight = 0.001 * jax.random.normal(kw, (CLASS_NUM, IN_DIM), dtype=jnp.float32)

    feat, cls = bn_classifier(x, gamma, beta, weight)
    feat = jax.block_until_ready(feat)
    cls = jax.block_until_ready(cls)

    feat_ref, cls_ref = reference(x, gamma, beta, weight)
    assert feat.shape == (N, IN_DIM) and cls.shape == (N, CLASS_NUM)
    assert jnp.allclose(feat, feat_ref, atol=1e-4, rtol=1e-4), "feature mismatch"
    assert jnp.allclose(cls, cls_ref, atol=1e-4, rtol=1e-4), "cls_score mismatch"

    print("KERNEL_OK")
</pallas_src>

<mosaic_0001>
module attributes {stable_mosaic.version = 11 : i64} {
  func.func @kernel(%arg0: i32, %arg1: memref<8x128xf32, #tpu.memory_space<vmem>>, %arg2: memref<1x128xf32, #tpu.memory_space<vmem>>, %arg3: memref<1x128xf32, #tpu.memory_space<vmem>>, %arg4: memref<128x128xf32, #tpu.memory_space<vmem>>, %arg5: memref<8x128xf32, #tpu.memory_space<vmem>>, %arg6: memref<8x128xf32, #tpu.memory_space<vmem>>) attributes {dimension_semantics = [#tpu.dimension_semantics<arbitrary>], iteration_bounds = array<i64: 1>, scalar_prefetch = 0 : i64, scratch_operands = 0 : i64, tpu.core_type = #tpu.core_type<tc>, window_params = [{pipeline_mode = #tpu.pipeline_mode<synchronous>, transform_indices = @transform_0, window_bounds = array<i64: 8, 128>}, {pipeline_mode = #tpu.pipeline_mode<synchronous>, transform_indices = @transform_1, window_bounds = array<i64: 1, 128>}, {pipeline_mode = #tpu.pipeline_mode<synchronous>, transform_indices = @transform_2, window_bounds = array<i64: 1, 128>}, {transform_indices = @transform_3, window_bounds = array<i64: 128, 128>}, {pipeline_mode = #tpu.pipeline_mode<synchronous>, transform_indices = @transform_4, window_bounds = array<i64: 8, 128>}, {transform_indices = @transform_5, window_bounds = array<i64: 8, 128>}]} {
    %c0_i32 = arith.constant 0 : i32
    %0 = arith.cmpi eq, %arg0, %c0_i32 : i32
    %1 = arith.extui %0 : i1 to i32
    %c0_i32_0 = arith.constant 0 : i32
    %2 = arith.cmpi ne, %1, %c0_i32_0 : i32
    scf.if %2 {
      %c0_6 = arith.constant 0 : index
      %c0_7 = arith.constant 0 : index
      %7 = vector.load %arg1[%c0_6, %c0_7] : memref<8x128xf32, #tpu.memory_space<vmem>>, vector<8x128xf32>
      %cst_8 = arith.constant dense<0.000000e+00> : vector<128xf32>
      %8 = vector.multi_reduction <add>, %7, %cst_8 [0] : vector<8x128xf32> to vector<128xf32>
      %9 = vector.shape_cast %8 : vector<128xf32> to vector<1x128xf32>
      %cst_9 = arith.constant 1.250000e-01 : f32
      %10 = vector.broadcast %cst_9 : f32 to vector<1x128xf32>
      %11 = arith.mulf %9, %10 : vector<1x128xf32>
      %12 = vector.broadcast %11 : vector<1x128xf32> to vector<8x128xf32>
      %13 = arith.subf %7, %12 : vector<8x128xf32>
      %14 = arith.mulf %13, %13 : vector<8x128xf32>
      %cst_10 = arith.constant dense<0.000000e+00> : vector<128xf32>
      %15 = vector.multi_reduction <add>, %14, %cst_10 [0] : vector<8x128xf32> to vector<128xf32>
      %16 = vector.shape_cast %15 : vector<128xf32> to vector<1x128xf32>
      %cst_11 = arith.constant 1.250000e-01 : f32
      %17 = vector.broadcast %cst_11 : f32 to vector<1x128xf32>
      %18 = arith.mulf %16, %17 : vector<1x128xf32>
      %cst_12 = arith.constant 9.99999974E-6 : f32
      %19 = vector.broadcast %cst_12 : f32 to vector<1x128xf32>
      %20 = arith.addf %18, %19 : vector<1x128xf32>
      %21 = math.rsqrt %20 : vector<1x128xf32>
      %c0_13 = arith.constant 0 : index
      %c0_14 = arith.constant 0 : index
      %22 = vector.load %arg2[%c0_13, %c0_14] : memref<1x128xf32, #tpu.memory_space<vmem>>, vector<1x128xf32>
      %23 = arith.mulf %21, %22 : vector<1x128xf32>
      %24 = vector.broadcast %23 : vector<1x128xf32> to vector<8x128xf32>
      %25 = arith.mulf %13, %24 : vector<8x128xf32>
      %c0_15 = arith.constant 0 : index
      %c0_16 = arith.constant 0 : index
      %26 = vector.load %arg3[%c0_15, %c0_16] : memref<1x128xf32, #tpu.memory_space<vmem>>, vector<1x128xf32>
      %27 = vector.broadcast %26 : vector<1x128xf32> to vector<8x128xf32>
      %28 = arith.addf %25, %27 : vector<8x128xf32>
      %c0_17 = arith.constant 0 : index
      %c0_18 = arith.constant 0 : index
      %29 = vector.load %arg5[%c0_17, %c0_18] : memref<8x128xf32, #tpu.memory_space<vmem>>, vector<8x128xf32>
      tpu.vector_store %arg5[%c0_17, %c0_18], %28 {strides = array<i32>} : memref<8x128xf32, #tpu.memory_space<vmem>>, vector<8x128xf32>,
    } else {
    }
    %c0 = arith.constant 0 : index
    %c0_1 = arith.constant 0 : index
    %3 = vector.load %arg5[%c0, %c0_1] : memref<8x128xf32, #tpu.memory_space<vmem>>, vector<8x128xf32>
    %c0_2 = arith.constant 0 : index
    %c0_3 = arith.constant 0 : index
    %4 = vector.load %arg4[%c0_2, %c0_3] : memref<128x128xf32, #tpu.memory_space<vmem>>, vector<128x128xf32>
    %cst = arith.constant dense<0.000000e+00> : vector<8x128xf32>
    %5 = tpu.matmul %3, %4, %cst {dimension_numbers = #tpu.dot_dimension_numbers<[1], [0], [0], [1], [0, 0, 1, 1], [], []>} : vector<8x128xf32>, vector<128x128xf32>, vector<8x128xf32> -> vector<8x128xf32>
    %c0_4 = arith.constant 0 : index
    %c0_5 = arith.constant 0 : index
    %6 = vector.load %arg6[%c0_4, %c0_5] : memref<8x128xf32, #tpu.memory_space<vmem>>, vector<8x128xf32>
    tpu.vector_store %arg6[%c0_4, %c0_5], %5 {strides = array<i32>} : memref<8x128xf32, #tpu.memory_space<vmem>>, vector<8x128xf32>,
    return
  }
  func.func @transform_0(%arg0: i32) -> (i32, i32) {
    %c0_i32 = arith.constant 0 : i32
    %c0_i32_0 = arith.constant 0 : i32
    %c0_i32_1 = arith.constant 0 : i32
    return %c0_i32, %c0_i32_0 : i32, i32
  }
  func.func @transform_1(%arg0: i32) -> (i32, i32) {
    %c0_i32 = arith.constant 0 : i32
    %c0_i32_0 = arith.constant 0 : i32
    %c0_i32_1 = arith.constant 0 : i32
    return %c0_i32, %c0_i32_0 : i32, i32
  }
  func.func @transform_2(%arg0: i32) -> (i32, i32) {
    %c0_i32 = arith.constant 0 : i32
    %c0_i32_0 = arith.constant 0 : i32
    %c0_i32_1 = arith.constant 0 : i32
    return %c0_i32, %c0_i32_0 : i32, i32
  }
  func.func @transform_3(%arg0: i32) -> (i32, i32) {
    %c0_i32 = arith.constant 0 : i32
    %c0_i32_0 = arith.constant 0 : i32
    return %c0_i32, %arg0 : i32, i32
  }
  func.func @transform_4(%arg0: i32) -> (i32, i32) {
    %c0_i32 = arith.constant 0 : i32
    %c0_i32_0 = arith.constant 0 : i32
    %c0_i32_1 = arith.constant 0 : i32
    return %c0_i32, %c0_i32_0 : i32, i32
  }
  func.func @transform_5(%arg0: i32) -> (i32, i32) {
    %c0_i32 = arith.constant 0 : i32
    %c0_i32_0 = arith.constant 0 : i32
    return %c0_i32, %arg0 : i32, i32
  }
}

</mosaic_0001>

<bundles_post_ra>
// kernel: tpu_custom_call.1
= control target key start
LH: loop header
LB: loop body
LE: loop exit
PB: predicated region body
PF: predicated region fallthrough
CT: control target
= control target key end

     0   :  { %11 = vsyncpa [#allocation3], 0  ;;  %s371_s0 = inlined_call_operand.hbm [shape: f32[8,128], index: 0, kind: input, shape index: {}]   ;;  %s372_s1 = inlined_call_operand.hbm [shape: f32[1,128], index: 1, kind: input, shape index: {}]   ;;  %s373_s2 = inlined_call_operand.vmem [shape: f32[1,128], index: 2, kind: input, shape index: {}]   ;;  %s374_s3 = inlined_call_operand.hbm [shape: f32[128,128], index: 3, kind: input, shape index: {}]   ;;  %s375_s4 = inlined_call_operand.hbm [shape: f32[8,128], index: 4, kind: output, shape index: {0}]   ;;  %s376_s5 = inlined_call_operand.hbm [shape: f32[8,128], index: 5, kind: output, shape index: {1}]  }
   0x1   :  { %12 = vsyncpa [#allocation6], 0 }
   0x2   :  { %13 = vsyncpa [#allocation4], 0  ;;  %s31_s20 = sshll.u32 %s372_s1, 4  ;;  %s32_s20 = int_to_ptr.hbm [resolvable:$true] %s31_s20 }
   0x3   :  { %14 = vsyncpa [#allocation10], 0  ;;  %s316_s21 = smov [#allocation5]   ;;  %s20_s25 = sshll.u32 %s371_s0, 4  ;;  %s21_s25 = int_to_ptr.hbm [resolvable:$true] %s20_s25 }
   0x4   :  { %s33_s22 = sshll.u32 %s316_s21, 4  ;;  %s317_s26 = smov [#allocation2]   ;;  %s34_s22 = int_to_ptr.vmem [resolvable:$true] %s33_s22 }
   0x5   :  { %36 = dma.hbm_to_vmem [thread:$0]  %s32_s20, 16, %s34_s22, [#allocation6]  }
   0x6   :  { %s22_s27 = sshll.u32 %s317_s26, 4  ;;  %s43_s30 = sshll.u32 %s374_s3, 4  ;;  %s23_s27 = int_to_ptr.vmem [resolvable:$true] %s22_s27  ;;  %s44_s30 = int_to_ptr.hbm [resolvable:$true] %s43_s30 }
   0x7   :  { %25 = dma.hbm_to_vmem [thread:$0]  %s21_s25, 128, %s23_s27, [#allocation3]  }
   0x8   :  { %s318_s1 = smov [#allocation7]   ;;  %s319_s7 = smov 128  }
   0x9   :  { %s45_s6 = sshll.u32 %s318_s1, 4  ;;  %s320_s8 = smov 8   ;;  %s46_s6 = int_to_ptr.vmem [resolvable:$true] %s45_s6 }
   0xa   :  { %51 = dma.hbm_to_vmem [thread:$0]  %s44_s30, 2048, %s46_s6, [#allocation6], %s319_s7, %s319_s7, %s320_s8  }
   0xb   :  { %308 = dma.done.wait [#allocation3], 128  }
   0xc   :  { %309 = vsyncadd [#allocation3], 4294967168 }
   0xd   :  { %310 = dma.done.wait [#allocation6], 2064  }
   0xe   :  { %311 = vsyncadd [#allocation6], 4294965232  ;;  %v122_v0 = vld [vmem:[#allocation7 + $0x78] sm:$0xff]  ;;  %v121_v1 = vld [vmem:[#allocation7 + $0x70] sm:$0xff]  ;;  %s321_s9 = smov [#allocation8]   ;;  %s151_s13 = sshll.u32 %s375_s4, 4  ;;  %s152_s13 = int_to_ptr.hbm [resolvable:$true] %s151_s13 }
   0xf   :  { %123 = vmatpush.msra.mxu0 %v122_v0  ;;  %v120_v2 = vld [vmem:[#allocation7 + $0x68] sm:$0xff]  ;;  %v119_v3 = vld [vmem:[#allocation7 + $0x60] sm:$0xff]  ;;  %v68_v4 = vld [vmem:[#allocation2] sm:$0xff]  ;;  %s149_s10 = sshll.u32 %s321_s9, 4  ;;  %s322_s14 = smov [#allocation9]   ;;  %s150_s10 = int_to_ptr.vmem [resolvable:$true] %s149_s10 }
  0x10   :  { %v118_v5 = vld [vmem:[#allocation7 + $0x58] sm:$0xff]  ;;  %v69_v6 = vrot.slane %v68_v4, 4  ;;  %v117_v7 = vld [vmem:[#allocation7 + $0x50] sm:$0xff]  ;;  %v116_v9 = vld [vmem:[#allocation7 + $0x48] sm:$0xff]  ;;  %s160_s15 = sshll.u32 %s322_s14, 4  ;;  %s162_s18 = sshll.u32 %s376_s5, 4  ;;  %s161_s15 = int_to_ptr.vmem [resolvable:$true] %s160_s15  ;;  %s163_s18 = int_to_ptr.hbm [resolvable:$true] %s162_s18 }
  0x11   :  { %124 = vmatpush.msra.mxu0 %v121_v1  ;;  %v115_v11 = vld [vmem:[#allocation7 + $0x40] sm:$0xff]  ;;  %v114_v13 = vld [vmem:[#allocation7 + $0x38] sm:$0xff]  ;;  %v113_v15 = vld [vmem:[#allocation7 + $0x30] sm:$0xff] }
  0x12   :  { %v70_v8 = vadd.f32 %v69_v6, %v68_v4  ;;  %v112_v17 = vld [vmem:[#allocation7 + $0x28] sm:$0xff]  ;;  %v111_v19 = vld [vmem:[#allocation7 + $0x20] sm:$0xff]  ;;  %v110_v21 = vld [vmem:[#allocation7 + $0x18] sm:$0xff] }
  0x13   :  { %125 = vmatpush.msra.mxu0 %v120_v2  ;;  %v109_v23 = vld [vmem:[#allocation7 + $0x10] sm:$0xff]  ;;  %v108_v25 = vld [vmem:[#allocation7 + $0x8] sm:$0xff]  ;;  %v107_v27 = vld [vmem:[#allocation7] sm:$0xff] }
  0x14   :  { %v71_v10 = vrot.slane %v70_v8, 2  ;;  %v96_v40 = vld [vmem:[#allocation5] sm:$0x1]  ;;  %v185_v44 = vld [vmem:[%s373_s2] ss:$0 sm:$0xff] }
  0x15   :  { %126 = vmatpush.msra.mxu0 %v119_v3 }
  0x16   :  { %v72_v12 = vadd.f32 %v71_v10, %v70_v8 }
  0x17   :  { %127 = vmatpush.msra.mxu0 %v118_v5 }
  0x18   :  { %v73_v14 = vrot.slane %v72_v12, 1 }
  0x19   :  { %128 = vmatpush.msra.mxu0 %v117_v7 }
  0x1a   :  { %v74_v16 = vadd.f32 %v73_v14, %v72_v12 }
  0x1b   :  { %129 = vmatpush.msra.mxu0 %v116_v9 }
  0x1c   :  { %v75_v18 = vmul.f32 0.125, %v74_v16 }
  0x1d   :  { %130 = vmatpush.msra.mxu0 %v115_v11 }
  0x1e   :  { %v76_v20 = vsub.f32 %v68_v4, %v75_v18 }
  0x1f   :  { %131 = vmatpush.msra.mxu0 %v114_v13 }
  0x20   :  { %v77_v22 = vmul.f32 %v76_v20, %v76_v20 }
  0x21   :  { %132 = vmatpush.msra.mxu0 %v113_v15 }
  0x22   :  { %v78_v24 = vrot.slane %v77_v22, 4 }
  0x23   :  { %133 = vmatpush.msra.mxu0 %v112_v17 }
  0x24   :  { %v79_v26 = vadd.f32 %v78_v24, %v77_v22 }
  0x25   :  { %134 = vmatpush.msra.mxu0 %v111_v19 }
  0x26   :  { %v80_v28 = vrot.slane %v79_v26, 2 }
  0x27   :  { %135 = vmatpush.msra.mxu0 %v110_v21 }
  0x28   :  { %v81_v29 = vadd.f32 %v80_v28, %v79_v26 }
  0x29   :  { %136 = vmatpush.msra.mxu0 %v109_v23 }
  0x2a   :  { %v82_v30 = vrot.slane %v81_v29, 1 }
  0x2b   :  { %137 = vmatpush.msra.mxu0 %v108_v25 }
  0x2c   :  { %v83_v31 = vadd.f32 %v82_v30, %v81_v29 }
  0x2d   :  { %138 = vmatpush.msra.mxu0 %v107_v27 }
  0x2e   :  { %v84_v32 = vmul.f32 0.125, %v83_v31 }
  0x30   :  { %v85_v33 = vadd.f32 1e-05, %v84_v32 }
  0x32   :  { %186 = vrsqrt.f32 %v85_v33  ;;  %vm92_vm0 = vweird.f32 %v85_v33 }
  0x38   :  { %v187_v34 = vpop.eup %186 }
  0x39   :  { %v87_v35 = vmul.f32 %v187_v34, %v85_v33  ;;  %vm93_vm1 = vweird.f32 %v187_v34 }
  0x3a   :  { %vm94_vm2 = vmor %vm92_vm0, %vm93_vm1 }
  0x3b   :  { %v88_v36 = vmul.f32 %v187_v34, %v87_v35 }
  0x3d   :  { %v89_v37 = vmul.f32 0.5, %v88_v36 }
  0x3f   :  { %v90_v38 = vsub.f32 1.5, %v89_v37 }
  0x41   :  { %v91_v39 = vmul.f32 %v187_v34, %v90_v38 }
  0x43   :  { %v95_v41 = vsel %vm94_vm2, %v187_v34, %v91_v39 }
  0x44   :  { %v97_v42 = vmul.f32 %v96_v40, %v95_v41 }
  0x46   :  { %v98_v43 = vperm.slane %v97_v42, 0 }
  0x48   :  { %v99_v45 = vmul.f32 %v98_v43, %v76_v20 }
  0x4a   :  { %v104_v46 = vadd.f32 %v185_v44, %v99_v45 }
  0x4c   :  { %105 = vst [vmem:[#allocation8] sm:$0xff] %v104_v46  ;;  %139 = vmatmul.f32.vlgmr.msra.gmra.mxu0 %v104_v46 }
  0x4d   :  { %154 = dma.vmem_to_hbm [thread:$0]  %s150_s10, 128, %s152_s13, [#allocation4]  }
  0xc9   :  { %v140_v47 = vpop.f32.mrf.mxu0 }
  0xca   :  { %143 = vst [vmem:[#allocation9] sm:$0xff] %v140_v47 }
  0xcb   :  { %165 = dma.vmem_to_hbm [thread:$0]  %s161_s15, 128, %s163_s18, [#allocation10]  }
  0xcc   :  { %312 = dma.done.wait [#allocation4], 128  }
  0xcd   :  { %313 = vsyncadd [#allocation4], 4294967168 }
  0xce   :  { %314 = dma.done.wait [#allocation10], 128  }
  0xcf   :  { %315 = vsyncadd [#allocation10], 4294967168 }
  0xd0   :  { %174 = vsyncpa [#allocation3], 1 }
  0xd1   :  { %175 = vsyncpa [#allocation6], 1 }
  0xd2   :  { %176 = vsyncpa [#allocation4], 1 }
  0xd3   :  { %177 = vsyncpa [#allocation10], 1 }

</bundles_post_ra>
